<compile_context>
chip_gen: v7x
topology: tpu7x:2x2x1
jax: 0.10.0
libtpu: 0.0.40
codegen_flags: <defaults>
</compile_context>

<pallas_src>
import functools

import jax
import jax.numpy as jnp
from jax import lax
from jax.experimental import pallas as pl
from jax.experimental.pallas import tpu as pltpu


def _round_up(v, mult):
    return ((v + mult - 1) // mult) * mult


def _style_loss_kernel(fx_ref, ft_ref, o_ref, gx_acc, gt_acc, *, scale):
    # fx_ref / ft_ref: (n_pad, tm) feature tiles (caller dtype) in VMEM.
    # gx_acc / gt_acc: (n_pad, n_pad) f32 raw-Gram accumulators in VMEM scratch.
    # o_ref: (1, 1) f32 scalar in SMEM.
    k = pl.program_id(0)

    @pl.when(k == 0)
    def _():
        gx_acc[...] = jnp.zeros_like(gx_acc)
        gt_acc[...] = jnp.zeros_like(gt_acc)

    fx = fx_ref[...]
    ft = ft_ref[...]

    # Contract last dim against last dim (MXU-native "rhs transposed" form,
    # no materialized transpose). Accumulate in f32.
    dn = (((1,), (1,)), ((), ()))
    gx_acc[...] += lax.dot_general(fx, fx, dimension_numbers=dn,
                                   preferred_element_type=jnp.float32)
    gt_acc[...] += lax.dot_general(ft, ft, dimension_numbers=dn,
                                   preferred_element_type=jnp.float32)

    @pl.when(k == pl.num_programs(0) - 1)
    def _():
        diff = gx_acc[...] - gt_acc[...]          # f32 epilogue (v5e-safe)
        o_ref[0, 0] = jnp.sum(diff * diff) * scale


def style_loss(x, target, *, max_tile_m=4096):
    """x, target: (b, c, h, w) arrays of identical shape. Returns scalar f32."""
    assert x.shape == target.shape
    b, c, h, w = x.shape
    n = b * c
    m = h * w

    # Keep the caller's dtype; the MXU accumulates in f32 regardless.
    fx = x.reshape(n, m)
    ft = target.reshape(n, m)
    dtype_bytes = jnp.dtype(fx.dtype).itemsize

    # Lane-dense row padding for the (n, n) Gram tiles (128, or 256-multiples
    # for the wider v6e/v7x MXU when n is already large).
    n_pad = 128 if n <= 128 else _round_up(n, 256)

    # Tile width over the contraction dim: multiple of 128 lanes, capped so
    # the double-buffered input tiles stay within a ~16 MiB budget.
    budget = 16 * 1024 * 1024
    tm_cap = (budget // (4 * n_pad * dtype_bytes)) // 128 * 128
    tm_cap = max(128, min(max_tile_m, tm_cap))
    m128 = _round_up(m, 128)
    tm = min(tm_cap, m128)
    kt = -(-m128 // tm)                       # number of grid steps
    tm = _round_up(-(-m128 // kt), 128)       # rebalance to minimize padding
    m_pad = tm * kt

    # Zero-pad: extra rows/cols contribute 0 to both raw Grams and the diff.
    if n_pad != n or m_pad != m:
        fx = jnp.pad(fx, ((0, n_pad - n), (0, m_pad - m)))
        ft = jnp.pad(ft, ((0, n_pad - n), (0, m_pad - m)))

    # All scaling folded into one epilogue scalar:
    #   loss = (1/(h*w))^2 * (1/c^2) * (1/(b*c)^2) * sum((A_x - A_t)^2)
    inv_hw = 1.0 / float(m)
    scale = (inv_hw * inv_hw) * (1.0 / float(c) ** 2) / float(n * n)

    kernel = functools.partial(_style_loss_kernel, scale=scale)

    input_bytes = 2 * 2 * n_pad * tm * dtype_bytes   # 2 inputs x double buffer
    acc_bytes = 2 * n_pad * n_pad * 4
    vmem_limit = int(min(max(input_bytes + acc_bytes + (4 << 20), 16 << 20),
                         48 << 20))

    out = pl.pallas_call(
        kernel,
        out_shape=jax.ShapeDtypeStruct((1, 1), jnp.float32),
        grid_spec=pltpu.PrefetchScalarGridSpec(
            num_scalar_prefetch=0,
            grid=(kt,),
            in_specs=[
                pl.BlockSpec((n_pad, tm), lambda k: (0, k)),
                pl.BlockSpec((n_pad, tm), lambda k: (0, k)),
            ],
            out_specs=pl.BlockSpec(memory_space=pltpu.MemorySpace.SMEM),
            scratch_shapes=[
                pltpu.VMEM((n_pad, n_pad), jnp.float32),
                pltpu.VMEM((n_pad, n_pad), jnp.float32),
            ],
        ),
        compiler_params=pltpu.CompilerParams(
            dimension_semantics=("arbitrary",),
            vmem_limit_bytes=vmem_limit,
        ),
    )(fx, ft)
    return out[0, 0]


def _reference_style_loss(x, target):
    b, c, h, w = x.shape
    fx = x.reshape(b * c, h * w).astype(jnp.float32)
    ft = target.reshape(b * c, h * w).astype(jnp.float32)
    gx = fx @ fx.T / (h * w)
    gt = ft @ ft.T / (h * w)
    return (1.0 / c**2) * jnp.mean((gx - gt) ** 2)


if __name__ == "__main__":
    key = jax.random.PRNGKey(0)
    kx, kt_ = jax.random.split(key)

    b, c, h, w = 2, 4, 16, 16
    x = jax.random.normal(kx, (b, c, h, w), dtype=jnp.float32)
    target = jax.random.normal(kt_, (b, c, h, w), dtype=jnp.float32)

    loss = jax.block_until_ready(style_loss(x, target))
    ref = jax.block_until_ready(_reference_style_loss(x, target))

    assert jnp.allclose(loss, ref, rtol=1e-5, atol=1e-6), (loss, ref)
    print("KERNEL_OK")
</pallas_src>

<mosaic_0001>
module attributes {stable_mosaic.version = 11 : i64} {
  func.func @_style_loss_kernel(%arg0: i32, %arg1: memref<128x256xf32, #tpu.memory_space<vmem>>, %arg2: memref<128x256xf32, #tpu.memory_space<vmem>>, %arg3: memref<1x1xf32, #tpu.memory_space<smem>>, %arg4: memref<128x128xf32, #tpu.memory_space<vmem>>, %arg5: memref<128x128xf32, #tpu.memory_space<vmem>>) attributes {dimension_semantics = [#tpu.dimension_semantics<arbitrary>], iteration_bounds = array<i64: 1>, scalar_prefetch = 0 : i64, scratch_operands = 2 : i64, tpu.core_type = #tpu.core_type<tc>, window_params = [{transform_indices = @transform_0, window_bounds = array<i64: 128, 256>}, {transform_indices = @transform_1, window_bounds = array<i64: 128, 256>}, {transform_indices = @transform_2, window_bounds = array<i64: 1, 1>}]} {
    %c0_i32 = arith.constant 0 : i32
    %0 = arith.cmpi eq, %arg0, %c0_i32 : i32
    %1 = arith.extui %0 : i1 to i32
    %c0_i32_0 = arith.constant 0 : i32
    %2 = arith.cmpi ne, %1, %c0_i32_0 : i32
    scf.if %2 {
      %cst_15 = arith.constant 0.000000e+00 : f32
      %16 = vector.broadcast %cst_15 : f32 to vector<128x128xf32>
      %c0_16 = arith.constant 0 : index
      %c0_17 = arith.constant 0 : index
      %17 = vector.load %arg4[%c0_16, %c0_17] : memref<128x128xf32, #tpu.memory_space<vmem>>, vector<128x128xf32>
      tpu.vector_store %arg4[%c0_16, %c0_17], %16 {strides = array<i32>} : memref<128x128xf32, #tpu.memory_space<vmem>>, vector<128x128xf32>,
      %cst_18 = arith.constant 0.000000e+00 : f32
      %18 = vector.broadcast %cst_18 : f32 to vector<128x128xf32>
      %c0_19 = arith.constant 0 : index
      %c0_20 = arith.constant 0 : index
      %19 = vector.load %arg5[%c0_19, %c0_20] : memref<128x128xf32, #tpu.memory_space<vmem>>, vector<128x128xf32>
      tpu.vector_store %arg5[%c0_19, %c0_20], %18 {strides = array<i32>} : memref<128x128xf32, #tpu.memory_space<vmem>>, vector<128x128xf32>,
    } else {
    }
    %c0 = arith.constant 0 : index
    %c0_1 = arith.constant 0 : index
    %3 = vector.load %arg1[%c0, %c0_1] : memref<128x256xf32, #tpu.memory_space<vmem>>, vector<128x256xf32>
    %c0_2 = arith.constant 0 : index
    %c0_3 = arith.constant 0 : index
    %4 = vector.load %arg2[%c0_2, %c0_3] : memref<128x256xf32, #tpu.memory_space<vmem>>, vector<128x256xf32>
    %c0_4 = arith.constant 0 : index
    %c0_5 = arith.constant 0 : index
    %5 = vector.load %arg4[%c0_4, %c0_5] : memref<128x128xf32, #tpu.memory_space<vmem>>, vector<128x128xf32>
    %cst = arith.constant dense<0.000000e+00> : vector<128x128xf32>
    %6 = tpu.matmul %3, %3, %cst {dimension_numbers = #tpu.dot_dimension_numbers<[1], [1], [0], [0], [0, 0, 1, 0], [], []>} : vector<128x256xf32>, vector<128x256xf32>, vector<128x128xf32> -> vector<128x128xf32>
    %7 = arith.addf %5, %6 : vector<128x128xf32>
    %c0_6 = arith.constant 0 : index
    %c0_7 = arith.constant 0 : index
    %8 = vector.load %arg4[%c0_6, %c0_7] : memref<128x128xf32, #tpu.memory_space<vmem>>, vector<128x128xf32>
    tpu.vector_store %arg4[%c0_6, %c0_7], %7 {strides = array<i32>} : memref<128x128xf32, #tpu.memory_space<vmem>>, vector<128x128xf32>,
    %c0_8 = arith.constant 0 : index
    %c0_9 = arith.constant 0 : index
    %9 = vector.load %arg5[%c0_8, %c0_9] : memref<128x128xf32, #tpu.memory_space<vmem>>, vector<128x128xf32>
    %cst_10 = arith.constant dense<0.000000e+00> : vector<128x128xf32>
    %10 = tpu.matmul %4, %4, %cst_10 {dimension_numbers = #tpu.dot_dimension_numbers<[1], [1], [0], [0], [0, 0, 1, 0], [], []>} : vector<128x256xf32>, vector<128x256xf32>, vector<128x128xf32> -> vector<128x128xf32>
    %11 = arith.addf %9, %10 : vector<128x128xf32>
    %c0_11 = arith.constant 0 : index
    %c0_12 = arith.constant 0 : index
    %12 = vector.load %arg5[%c0_11, %c0_12] : memref<128x128xf32, #tpu.memory_space<vmem>>, vector<128x128xf32>
    tpu.vector_store %arg5[%c0_11, %c0_12], %11 {strides = array<i32>} : memref<128x128xf32, #tpu.memory_space<vmem>>, vector<128x128xf32>,
    %c0_i32_13 = arith.constant 0 : i32
    %13 = arith.cmpi eq, %arg0, %c0_i32_13 : i32
    %14 = arith.extui %13 : i1 to i32
    %c0_i32_14 = arith.constant 0 : i32
    %15 = arith.cmpi ne, %14, %c0_i32_14 : i32
    scf.if %15 {
      %c0_15 = arith.constant 0 : index
      %c0_16 = arith.constant 0 : index
      %16 = vector.load %arg4[%c0_15, %c0_16] : memref<128x128xf32, #tpu.memory_space<vmem>>, vector<128x128xf32>
      %c0_17 = arith.constant 0 : index
      %c0_18 = arith.constant 0 : index
      %17 = vector.load %arg5[%c0_17, %c0_18] : memref<128x128xf32, #tpu.memory_space<vmem>>, vector<128x128xf32>
      %18 = arith.subf %16, %17 : vector<128x128xf32>
      %19 = arith.mulf %18, %18 : vector<128x128xf32>
      %20 = vector.shape_cast %19 : vector<128x128xf32> to vector<1x128x128xf32>
      %cst_19 = arith.constant dense<0.000000e+00> : vector<1xf32>
      %21 = vector.multi_reduction <add>, %20, %cst_19 [1, 2] : vector<1x128x128xf32> to vector<1xf32>
      %22 = vector.shape_cast %21 : vector<1xf32> to vector<1x1x1xf32>
      %23 = vector.extract %22[0, 0, 0] : f32 from vector<1x1x1xf32>
      %cst_20 = arith.constant 1.49011612E-8 : f32
      %24 = arith.mulf %23, %cst_20 : f32
      %c0_21 = arith.constant 0 : index
      %c0_22 = arith.constant 0 : index
      %25 = memref.load %arg3[%c0_21, %c0_22] : memref<1x1xf32, #tpu.memory_space<smem>>
      memref.store %24, %arg3[%c0_21, %c0_22] : memref<1x1xf32, #tpu.memory_space<smem>>
    } else {
    }
    return
  }
  func.func @transform_0(%arg0: i32) -> (i32, i32) {
    %c0_i32 = arith.constant 0 : i32
    %c0_i32_0 = arith.constant 0 : i32
    return %c0_i32, %arg0 : i32, i32
  }
  func.func @transform_1(%arg0: i32) -> (i32, i32) {
    %c0_i32 = arith.constant 0 : i32
    %c0_i32_0 = arith.constant 0 : i32
    return %c0_i32, %arg0 : i32, i32
  }
  func.func @transform_2(%arg0: i32) -> (i32, i32) {
    %c0_i32 = arith.constant 0 : i32
    %c0_i32_0 = arith.constant 0 : i32
    %c0_i32_1 = arith.constant 0 : i32
    return %c0_i32, %c0_i32_0 : i32, i32
  }
}

</mosaic_0001>

<bundles_post_ra>
// kernel: tpu_custom_call.1
= control target key start
LH: loop header
LB: loop body
LE: loop exit
PB: predicated region body
PF: predicated region fallthrough
CT: control target
= control target key end

     0   :  { %7 = vsyncpa [#allocation5], 0  ;;  %s1066_s0 = inlined_call_operand.hbm [shape: f32[128,256], index: 0, kind: input, shape index: {}]   ;;  %s1067_s1 = inlined_call_operand.hbm [shape: f32[128,256], index: 1, kind: input, shape index: {}]   ;;  %s1068_s2 = inlined_call_operand.hbm [shape: f32[1,1], index: 2, kind: output, shape index: {}]  }
   0x1   :  { %8 = vsyncpa [#allocation8], 0 }
   0x2   :  { %9 = vsyncpa [#allocation6], 0  ;;  %s766_s9 = smov [#allocation4]   ;;  %s706_s13 = scalar_lea.hbm %s1066_s0, 4096 }
   0x3   :  { %s15_s10 = sshll.u32 %s766_s9, 4  ;;  %p707_p0 = scmp.ne.s32.totalorder %s1066_s0, %s706_s13  ;;  %s16_s10 = int_to_ptr.vmem [resolvable:$true] %s15_s10 }
   0x4   :  { %p710_p1 = scmp.lt.u32.totalorder %s706_s13, %s1066_s0 }
   0x6   :  { %p712_p2 = pnand %p710_p1, %p707_p0 }
   0x8   :  { %715 = shalt.err (!%p712_p2)
}
   0x9   :  { %s716_s18 = scalar_lea.vmem %s16_s10, 4096  ;;  %p721_p4 = scmp.lt.s32.totalorder %s16_s10, %s16_s10 }
   0xa   :  { %p717_p3 = scmp.ne.s32.totalorder %s16_s10, %s716_s18  ;;  %p722_p5 = scmp.lt.s32.totalorder %s716_s18, %s716_s18 }
   0xc   :  { %p723_p6 = por %p722_p5, %p721_p4 }
   0xe   :  { %p724_p7 = pnand %p723_p6, %p717_p3 }
  0x10   :  { %727 = shalt.err (!%p724_p7)
}
  0x11   :  { %s767_s19 = smov 256   ;;  %s768_s20 = smov 16  }
  0x12   :  { %21 = dma.hbm_to_vmem [thread:$0]  %s1066_s0, 4096, %s16_s10, [#allocation5], %s767_s19, %s767_s19, %s768_s20  }
  0x13   :  { %s769_s23 = smov [#allocation7]   ;;  %s728_s27 = scalar_lea.hbm %s1067_s1, 4096 }
  0x14   :  { %s27_s24 = sshll.u32 %s769_s23, 4  ;;  %p729_p8 = scmp.ne.s32.totalorder %s1067_s1, %s728_s27  ;;  %s28_s24 = int_to_ptr.vmem [resolvable:$true] %s27_s24 }
  0x15   :  { %p732_p9 = scmp.lt.u32.totalorder %s728_s27, %s1067_s1 }
  0x17   :  { %p734_p10 = pnand %p732_p9, %p729_p8 }
  0x19   :  { %737 = shalt.err (!%p734_p10)
}
  0x1a   :  { %s738_s4 = scalar_lea.vmem %s28_s24, 4096  ;;  %p743_p12 = scmp.lt.s32.totalorder %s28_s24, %s28_s24 }
  0x1b   :  { %p739_p11 = scmp.ne.s32.totalorder %s28_s24, %s738_s4  ;;  %p744_p13 = scmp.lt.s32.totalorder %s738_s4, %s738_s4 }
  0x1d   :  { %p745_p0 = por %p744_p13, %p743_p12 }
  0x1f   :  { %p746_p1 = pnand %p745_p0, %p739_p11 }
  0x21   :  { %749 = shalt.err (!%p746_p1)
}
  0x22   :  { %33 = dma.hbm_to_vmem [thread:$0]  %s1067_s1, 4096, %s28_s24, [#allocation8], %s767_s19, %s767_s19, %s768_s20  }
  0x23   :  { %760 = dma.done.wait [#allocation5], 4096  }
  0x24   :  { %761 = vsyncadd [#allocation5], 4294963200 }
  0x25   :  { %762 = dma.done.wait [#allocation8], 4096  }
  0x26   :  { %763 = vsyncadd [#allocation8], 4294963200  ;;  %v77_v0 = vld [vmem:[#allocation4 + $0x8] sm:$0xff]  ;;  %v810_v1 = vld [vmem:[#allocation4 + $0x18] sm:$0xff]  ;;  %s750_s9 = scalar_lea.hbm %s1068_s2, 16 }
  0x27   :  { %v109_v2 = vld [vmem:[#allocation7 + $0x8] sm:$0xff]  ;;  %v635_v3 = vpack.c.bf16 %v810_v1, %v77_v0  ;;  %v813_v4 = vld [vmem:[#allocation7 + $0x18] sm:$0xff]  ;;  %v815_v5 = vld [vmem:[#allocation4] sm:$0xff]  ;;  %220 = vmatprep.mubr.f32.mxu0 %v77_v0  ;;  %p751_p2 = scmp.ne.s32.totalorder %s1068_s2, %s750_s9  ;;  %p754_p3 = scmp.lt.u32.totalorder %s750_s9, %s1068_s2 }
  0x28   :  { %v817_v6 = vld [vmem:[#allocation4 + $0x10] sm:$0xff]  ;;  %413 = vmatprep.mubr.f32.mxu1 %v109_v2  ;;  %v667_v7 = vpack.c.bf16 %v813_v4, %v109_v2  ;;  %v822_v9 = vld [vmem:[#allocation7] sm:$0xff]  ;;  %v826_v11 = vld [vmem:[#allocation4 + $0x28] sm:$0xff] }
  0x29   :  { %v637_v8 = vpack.c.bf16 %v817_v6, %v815_v5  ;;  %v824_v10 = vld [vmem:[#allocation7 + $0x10] sm:$0xff]  ;;  %636 = vmatprep.subr.bf16.mxu0 %v635_v3  ;;  %v830_v13 = vld [vmem:[#allocation4 + $0x38] sm:$0xff]  ;;  %v832_v14 = vld [vmem:[#allocation7 + $0x28] sm:$0xff]  ;;  %p756_p4 = pnand %p754_p3, %p751_p2 }
  0x2a   :  { %v669_v12 = vpack.c.bf16 %v824_v10, %v822_v9  ;;  %v834_v15 = vld [vmem:[#allocation7 + $0x38] sm:$0xff]  ;;  %668 = vmatprep.subr.bf16.mxu1 %v667_v7  ;;  %v639_v16 = vpack.c.bf16 %v830_v13, %v826_v11  ;;  %v840_v18 = vld [vmem:[#allocation4 + $0x20] sm:$0xff]  ;;  %v842_v19 = vld [vmem:[#allocation4 + $0x30] sm:$0xff] }
  0x2b   :  { %638 = vmatpush1.bf16.xpose.msra.mxu0 %v637_v8  ;;  %v671_v17 = vpack.c.bf16 %v834_v15, %v832_v14  ;;  %v844_v20 = vld [vmem:[#allocation7 + $0x20] sm:$0xff]  ;;  %v846_v21 = vld [vmem:[#allocation7 + $0x30] sm:$0xff]  ;;  %v848_v22 = vld [vmem:[#allocation4 + $0x48] sm:$0xff]  ;;  %v641_v26 = vpack.c.bf16 %v842_v19, %v840_v18 }
  0x2c   :  { %670 = vmatpush1.bf16.xpose.msra.mxu1 %v669_v12  ;;  %640 = vmatprep.subr.bf16.mxu0 %v639_v16  ;;  %v850_v23 = vld [vmem:[#allocation4 + $0x58] sm:$0xff]  ;;  %v852_v24 = vld [vmem:[#allocation7 + $0x48] sm:$0xff]  ;;  %v673_v27 = vpack.c.bf16 %v846_v21, %v844_v20  ;;  %v864_v30 = vld [vmem:[#allocation4 + $0x40] sm:$0xff] }
  0x2d   :  { %672 = vmatprep.subr.bf16.mxu1 %v671_v17  ;;  %v854_v25 = vld [vmem:[#allocation7 + $0x58] sm:$0xff]  ;;  %v643_v28 = vpack.c.bf16 %v850_v23, %v848_v22  ;;  %v866_v31 = vld [vmem:[#allocation4 + $0x50] sm:$0xff]  ;;  %v868_v32 = vld [vmem:[#allocation7 + $0x40] sm:$0xff] }
  0x2e   :  { %v675_v29 = vpack.c.bf16 %v854_v25, %v852_v24  ;;  %v870_v33 = vld [vmem:[#allocation7 + $0x50] sm:$0xff]  ;;  %v872_v34 = vld [vmem:[#allocation4 + $0x68] sm:$0xff]  ;;  %v874_v35 = vld [vmem:[#allocation4 + $0x78] sm:$0xff]  ;;  %v645_v38 = vpack.c.bf16 %v866_v31, %v864_v30 }
  0x2f   :  { %v876_v36 = vld [vmem:[#allocation7 + $0x68] sm:$0xff]  ;;  %v878_v37 = vld [vmem:[#allocation7 + $0x78] sm:$0xff]  ;;  %v677_v39 = vpack.c.bf16 %v870_v33, %v868_v32  ;;  %v647_v40 = vpack.c.bf16 %v874_v35, %v872_v34  ;;  %v888_v42 = vld [vmem:[#allocation4 + $0x60] sm:$0xff] }
  0x30   :  { %v679_v41 = vpack.c.bf16 %v878_v37, %v876_v36  ;;  %v890_v43 = vld [vmem:[#allocation4 + $0x70] sm:$0xff]  ;;  %v892_v44 = vld [vmem:[#allocation7 + $0x60] sm:$0xff]  ;;  %v896_v46 = vld [vmem:[#allocation4 + $0x88] sm:$0xff] }
  0x31   :  { %v894_v45 = vld [vmem:[#allocation7 + $0x70] sm:$0xff]  ;;  %v898_v47 = vld [vmem:[#allocation4 + $0x98] sm:$0xff]  ;;  %v900_v48 = vld [vmem:[#allocation7 + $0x88] sm:$0xff]  ;;  %v649_v50 = vpack.c.bf16 %v890_v43, %v888_v42 }
  0x32   :  { %v902_v49 = vld [vmem:[#allocation7 + $0x98] sm:$0xff]  ;;  %v681_v51 = vpack.c.bf16 %v894_v45, %v892_v44  ;;  %v651_v52 = vpack.c.bf16 %v898_v47, %v896_v46  ;;  %v912_v54 = vld [vmem:[#allocation4 + $0x80] sm:$0xff]  ;;  %v914_v55 = vld [vmem:[#allocation4 + $0x90] sm:$0xff] }
  0x33   :  { %642 = vmatpush1.bf16.xpose.msra.mxu0 %v641_v26  ;;  %v683_v53 = vpack.c.bf16 %v902_v49, %v900_v48  ;;  %v916_v56 = vld [vmem:[#allocation7 + $0x80] sm:$0xff]  ;;  %v918_v57 = vld [vmem:[#allocation7 + $0x90] sm:$0xff]  ;;  %v920_v58 = vld [vmem:[#allocation4 + $0xa8] sm:$0xff]  ;;  %v653_v62 = vpack.c.bf16 %v914_v55, %v912_v54 }
  0x34   :  { %674 = vmatpush1.bf16.xpose.msra.mxu1 %v673_v27  ;;  %644 = vmatprep.subr.bf16.mxu0 %v643_v28  ;;  %v922_v59 = vld [vmem:[#allocation4 + $0xb8] sm:$0xff]  ;;  %v924_v60 = vld [vmem:[#allocation7 + $0xa8] sm:$0xff]  ;;  %v685_v63 = vpack.c.bf16 %v918_v57, %v916_v56  ;;  %v936_v3 = vld [vmem:[#allocation4 + $0xa0] sm:$0xff] }
  0x35   :  { %676 = vmatprep.subr.bf16.mxu1 %v675_v29  ;;  %v926_v61 = vld [vmem:[#allocation7 + $0xb8] sm:$0xff]  ;;  %v655_v0 = vpack.c.bf16 %v922_v59, %v920_v58  ;;  %v938_v7 = vld [vmem:[#allocation4 + $0xb0] sm:$0xff]  ;;  %v940_v8 = vld [vmem:[#allocation7 + $0xa0] sm:$0xff] }
  0x36   :  { %v687_v2 = vpack.c.bf16 %v926_v61, %v924_v60  ;;  %v942_v12 = vld [vmem:[#allocation7 + $0xb0] sm:$0xff]  ;;  %v944_v16 = vld [vmem:[#allocation4 + $0xc8] sm:$0xff]  ;;  %v946_v17 = vld [vmem:[#allocation4 + $0xd8] sm:$0xff]  ;;  %v657_v28 = vpack.c.bf16 %v938_v7, %v936_v3 }
  0x37   :  { %1073 = vst [vmem:[#allocation13_spill] sm:$0xff] %v946_v17  ;;  %v948_v26 = vld [vmem:[#allocation7 + $0xc8] sm:$0xff]  ;;  %v950_v27 = vld [vmem:[#allocation7 + $0xd8] sm:$0xff]  ;;  %v689_v29 = vpack.c.bf16 %v942_v12, %v940_v8 }
  0x38   :  { %1074 = vst [vmem:[#allocation14_spill] sm:$0xff] %v950_v27 }
  0x3b   :  { %646 = vmatpush1.bf16.xpose.msra.mxu0 %v645_v38  ;;  %v659_v38 = vpack.c.bf16 %v946_v17, %v944_v16  ;;  %v988_v17 = vld [vmem:[#allocation7 + $0xf0] sm:$0xff] }
  0x3c   :  { %678 = vmatpush1.bf16.xpose.msra.mxu1 %v677_v39  ;;  %648 = vmatprep.subr.bf16.mxu0 %v647_v40  ;;  %v691_v39 = vpack.c.bf16 %v950_v27, %v948_v26  ;;  %v960_v40 = vld [vmem:[#allocation4 + $0xc0] sm:$0xff] }
  0x3d   :  { %680 = vmatprep.subr.bf16.mxu1 %v679_v41  ;;  %v962_v41 = vld [vmem:[#allocation4 + $0xd0] sm:$0xff]  ;;  %v136_v27 = vld [vmem:[#allocation7 + $0xe0] sm:$0xff] }
  0x3e   :  { %1075 = vst [vmem:[#allocation15_spill] sm:$0xff] %v962_v41 }
  0x43   :  { %650 = vmatpush1.bf16.xpose.msra.mxu0 %v649_v50  ;;  %v964_v50 = vld [vmem:[#allocation7 + $0xc0] sm:$0xff] }
  0x44   :  { %682 = vmatpush1.bf16.xpose.msra.mxu1 %v681_v51  ;;  %652 = vmatprep.subr.bf16.mxu0 %v651_v52  ;;  %v966_v51 = vld [vmem:[#allocation7 + $0xd0] sm:$0xff]  ;;  %v968_v52 = vld [vmem:[#allocation4 + $0xe8] sm:$0xff] }
  0x45   :  { %684 = vmatprep.subr.bf16.mxu1 %v683_v53  ;;  %1076 = vst [vmem:[#allocation16_spill] sm:$0xff] %v966_v51  ;;  %v970_v53 = vld [vmem:[#allocation4 + $0xf8] sm:$0xff] }
  0x4b   :  { %654 = vmatpush1.bf16.xpose.msra.mxu0 %v653_v62  ;;  %v972_v62 = vld [vmem:[#allocation7 + $0xe8] sm:$0xff] }
  0x4c   :  { %686 = vmatpush1.bf16.xpose.msra.mxu1 %v685_v63  ;;  %656 = vmatprep.subr.bf16.mxu0 %v655_v0  ;;  %v974_v63 = vld [vmem:[#allocation7 + $0xf8] sm:$0xff]  ;;  %v661_v0 = vpack.c.bf16 %v962_v41, %v960_v40  ;;  %v697_v41 = vpack.c.bf16 %v988_v17, %v136_v27 }
  0x4d   :  { %688 = vmatprep.subr.bf16.mxu1 %v687_v2  ;;  %v693_v2 = vpack.c.bf16 %v966_v51, %v964_v50 }
  0x53   :  { %658 = vmatpush1.bf16.xpose.msra.mxu0 %v657_v28  ;;  %v663_v28 = vpack.c.bf16 %v970_v53, %v968_v52 }
  0x54   :  { %690 = vmatpush1.bf16.xpose.msra.mxu1 %v689_v29  ;;  %660 = vmatprep.subr.bf16.mxu0 %v659_v38  ;;  %v695_v29 = vpack.c.bf16 %v974_v63, %v972_v62  ;;  %v984_v38 = vld [vmem:[#allocation4 + $0xe0] sm:$0xff] }
  0x55   :  { %692 = vmatprep.subr.bf16.mxu1 %v691_v39  ;;  %v986_v39 = vld [vmem:[#allocation4 + $0xf0] sm:$0xff] }
  0x56   :  { %v665_v51 = vpack.c.bf16 %v986_v39, %v984_v38 }
  0x5b   :  { %662 = vmatpush1.bf16.xpose.msra.mxu0 %v661_v0 }
  0x5c   :  { %694 = vmatpush1.bf16.xpose.msra.mxu1 %v693_v2  ;;  %664 = vmatprep.subr.bf16.mxu0 %v663_v28 }
  0x5d   :  { %696 = vmatprep.subr.bf16.mxu1 %v695_v29 }
  0x63   :  { %666 = vmatpush1.bf16.xpose.msra.mxu0 %v665_v51 }
  0x64   :  { %698 = vmatpush1.bf16.xpose.msra.mxu1 %v697_v41 }
  0x6a   :  { %221 = vmatmul.mubr.f32.vlgmr.msra.gmra.mrb[0].mxu0 %v815_v5  ;;  %v1079_v5 = vld [vmem:[#allocation15_spill] sm:$0xff] }
  0x6b   :  { %414 = vmatmul.mubr.f32.vlgmr.msra.gmra.mrb[0].mxu1 %v822_v9  ;;  %225 = vmatprep.mubr.f32.mxu0 %v810_v1  ;;  %v1077_v1 = vld [vmem:[#allocation13_spill] sm:$0xff] }
  0x6c   :  { %418 = vmatprep.mubr.f32.mxu1 %v813_v4  ;;  %v1078_v4 = vld [vmem:[#allocation14_spill] sm:$0xff] }
  0x6e   :  { %226 = vmatmul.mubr.f32.gmra.mrb[2].mxu0 %v817_v6  ;;  %v1080_v6 = vld [vmem:[#allocation16_spill] sm:$0xff] }
  0x6f   :  { %419 = vmatmul.mubr.f32.gmra.mrb[2].mxu1 %v824_v10  ;;  %230 = vmatprep.mubr.f32.mxu0 %v826_v11 }
  0x70   :  { %423 = vmatprep.mubr.f32.mxu1 %v832_v14 }
  0x72   :  { %231 = vmatmul.mubr.f32.gmra.mrb[4].mxu0 %v840_v18 }
  0x73   :  { %424 = vmatmul.mubr.f32.gmra.mrb[4].mxu1 %v844_v20  ;;  %235 = vmatprep.mubr.f32.mxu0 %v830_v13 }
  0x74   :  { %428 = vmatprep.mubr.f32.mxu1 %v834_v15 }
  0x76   :  { %236 = vmatmul.mubr.f32.gmra.mrb[6].mxu0 %v842_v19 }
  0x77   :  { %429 = vmatmul.mubr.f32.gmra.mrb[6].mxu1 %v846_v21  ;;  %240 = vmatprep.mubr.f32.mxu0 %v848_v22 }
  0x78   :  { %433 = vmatprep.mubr.f32.mxu1 %v852_v24 }
  0x7a   :  { %241 = vmatmul.mubr.f32.gmra.mrb[8].mxu0 %v864_v30 }
  0x7b   :  { %434 = vmatmul.mubr.f32.gmra.mrb[8].mxu1 %v868_v32  ;;  %245 = vmatprep.mubr.f32.mxu0 %v850_v23 }
  0x7c   :  { %438 = vmatprep.mubr.f32.mxu1 %v854_v25 }
  0x7e   :  { %246 = vmatmul.mubr.f32.gmra.mrb[10].mxu0 %v866_v31 }
  0x7f   :  { %439 = vmatmul.mubr.f32.gmra.mrb[10].mxu1 %v870_v33  ;;  %250 = vmatprep.mubr.f32.mxu0 %v872_v34 }
  0x80   :  { %443 = vmatprep.mubr.f32.mxu1 %v876_v36 }
  0x82   :  { %251 = vmatmul.mubr.f32.gmra.mrb[12].mxu0 %v888_v42 }
  0x83   :  { %444 = vmatmul.mubr.f32.gmra.mrb[12].mxu1 %v892_v44  ;;  %255 = vmatprep.mubr.f32.mxu0 %v874_v35 }
  0x84   :  { %448 = vmatprep.mubr.f32.mxu1 %v878_v37 }
  0x86   :  { %256 = vmatmul.mubr.f32.gmra.mrb[14].mxu0 %v890_v43 }
  0x87   :  { %449 = vmatmul.mubr.f32.gmra.mrb[14].mxu1 %v894_v45  ;;  %260 = vmatprep.mubr.f32.mxu0 %v896_v46 }
  0x88   :  { %453 = vmatprep.mubr.f32.mxu1 %v900_v48 }
  0x8a   :  { %261 = vmatmul.mubr.f32.gmra.mrb[16].mxu0 %v912_v54 }
  0x8b   :  { %454 = vmatmul.mubr.f32.gmra.mrb[16].mxu1 %v916_v56  ;;  %265 = vmatprep.mubr.f32.mxu0 %v898_v47 }
  0x8c   :  { %458 = vmatprep.mubr.f32.mxu1 %v902_v49 }
  0x8e   :  { %266 = vmatmul.mubr.f32.gmra.mrb[18].mxu0 %v914_v55 }
  0x8f   :  { %459 = vmatmul.mubr.f32.gmra.mrb[18].mxu1 %v918_v57  ;;  %270 = vmatprep.mubr.f32.mxu0 %v920_v58 }
  0x90   :  { %463 = vmatprep.mubr.f32.mxu1 %v924_v60 }
  0x92   :  { %271 = vmatmul.mubr.f32.gmra.mrb[20].mxu0 %v936_v3 }
  0x93   :  { %464 = vmatmul.mubr.f32.gmra.mrb[20].mxu1 %v940_v8  ;;  %275 = vmatprep.mubr.f32.mxu0 %v922_v59 }
  0x94   :  { %468 = vmatprep.mubr.f32.mxu1 %v926_v61 }
  0x96   :  { %276 = vmatmul.mubr.f32.gmra.mrb[22].mxu0 %v938_v7 }
  0x97   :  { %469 = vmatmul.mubr.f32.gmra.mrb[22].mxu1 %v942_v12  ;;  %280 = vmatprep.mubr.f32.mxu0 %v944_v16 }
  0x98   :  { %473 = vmatprep.mubr.f32.mxu1 %v948_v26 }
  0x9a   :  { %281 = vmatmul.mubr.f32.gmra.mrb[24].mxu0 %v960_v40 }
  0x9b   :  { %474 = vmatmul.mubr.f32.gmra.mrb[24].mxu1 %v964_v50  ;;  %285 = vmatprep.mubr.f32.mxu0 %v1077_v1 }
  0x9c   :  { %478 = vmatprep.mubr.f32.mxu1 %v1078_v4 }
  0x9e   :  { %286 = vmatmul.mubr.f32.gmra.mrb[26].mxu0 %v1079_v5 }
  0x9f   :  { %479 = vmatmul.mubr.f32.gmra.mrb[26].mxu1 %v1080_v6  ;;  %290 = vmatprep.mubr.f32.mxu0 %v968_v52 }
  0xa0   :  { %483 = vmatprep.mubr.f32.mxu1 %v972_v62 }
  0xa2   :  { %291 = vmatmul.mubr.f32.gmra.mrb[28].mxu0 %v984_v38 }
  0xa3   :  { %484 = vmatmul.mubr.f32.gmra.mrb[28].mxu1 %v136_v27  ;;  %295 = vmatprep.mubr.f32.mxu0 %v970_v53 }
  0xa4   :  { %488 = vmatprep.mubr.f32.mxu1 %v974_v63 }
  0xa6   :  { %296 = vmatmul.mubr.f32.gmra.mrb[30].mxu0 %v986_v39 }
  0xa7   :  { %489 = vmatmul.mubr.f32.gmra.mrb[30].mxu1 %v988_v17 }
 0x13d   :  { %v222_v9 = vpop.f32.mrb[0].mxu0 }
 0x13e   :  { %v415_v10 = vpop.f32.mrb[0].mxu1  ;;  %v224_v11 = vpop.f32.mrb[1].mxu0 }
 0x13f   :  { %v561_v13 = vsub.f32 %v222_v9, %v415_v10  ;;  %v417_v14 = vpop.f32.mrb[1].mxu1 }
 0x141   :  { %v227_v15 = vpop.f32.mrb[2].mxu0  ;;  %v577_v22 = vmul.f32 %v561_v13, %v561_v13 }
 0x142   :  { %v420_v18 = vpop.f32.mrb[2].mxu1  ;;  %v229_v19 = vpop.f32.mrb[3].mxu0 }
 0x143   :  { %v562_v20 = vsub.f32 %v227_v15, %v420_v18  ;;  %v422_v21 = vpop.f32.mrb[3].mxu1 }
 0x145   :  { %v578_v23 = vmul.f32 %v562_v20, %v562_v20  ;;  %v232_v24 = vpop.f32.mrb[4].mxu0 }
 0x146   :  { %v425_v25 = vpop.f32.mrb[4].mxu1  ;;  %v234_v30 = vpop.f32.mrb[5].mxu0 }
 0x147   :  { %v593_v31 = vadd.f32 %v578_v23, %v577_v22  ;;  %v563_v32 = vsub.f32 %v232_v24, %v425_v25  ;;  %v427_v33 = vpop.f32.mrb[5].mxu1 }
 0x149   :  { %v579_v34 = vmul.f32 %v563_v32, %v563_v32  ;;  %v237_v35 = vpop.f32.mrb[6].mxu0 }
 0x14a   :  { %v430_v36 = vpop.f32.mrb[6].mxu1  ;;  %v239_v37 = vpop.f32.mrb[7].mxu0 }
 0x14b   :  { %v594_v42 = vadd.f32 %v593_v31, %v579_v34  ;;  %v564_v43 = vsub.f32 %v237_v35, %v430_v36  ;;  %v432_v44 = vpop.f32.mrb[7].mxu1 }
 0x14d   :  { %v580_v45 = vmul.f32 %v564_v43, %v564_v43  ;;  %v242_v46 = vpop.f32.mrb[8].mxu0 }
 0x14e   :  { %v435_v47 = vpop.f32.mrb[8].mxu1  ;;  %v244_v48 = vpop.f32.mrb[9].mxu0 }
 0x14f   :  { %v595_v49 = vadd.f32 %v594_v42, %v580_v45  ;;  %v565_v54 = vsub.f32 %v242_v46, %v435_v47  ;;  %v437_v55 = vpop.f32.mrb[9].mxu1 }
 0x151   :  { %v581_v56 = vmul.f32 %v565_v54, %v565_v54  ;;  %v247_v57 = vpop.f32.mrb[10].mxu0 }
 0x152   :  { %v440_v58 = vpop.f32.mrb[10].mxu1  ;;  %v249_v59 = vpop.f32.mrb[11].mxu0 }
 0x153   :  { %v596_v60 = vadd.f32 %v595_v49, %v581_v56  ;;  %v566_v61 = vsub.f32 %v247_v57, %v440_v58  ;;  %v442_v3 = vpop.f32.mrb[11].mxu1 }
 0x155   :  { %v582_v7 = vmul.f32 %v566_v61, %v566_v61  ;;  %v252_v8 = vpop.f32.mrb[12].mxu0 }
 0x156   :  { %v445_v12 = vpop.f32.mrb[12].mxu1  ;;  %v254_v16 = vpop.f32.mrb[13].mxu0 }
 0x157   :  { %v597_v17 = vadd.f32 %v596_v60, %v582_v7  ;;  %v567_v26 = vsub.f32 %v252_v8, %v445_v12  ;;  %v447_v27 = vpop.f32.mrb[13].mxu1 }
 0x159   :  { %v583_v40 = vmul.f32 %v567_v26, %v567_v26  ;;  %v257_v41 = vpop.f32.mrb[14].mxu0 }
 0x15a   :  { %v450_v50 = vpop.f32.mrb[14].mxu1  ;;  %v259_v51 = vpop.f32.mrb[15].mxu0 }
 0x15b   :  { %v598_v52 = vadd.f32 %v597_v17, %v583_v40  ;;  %v568_v53 = vsub.f32 %v257_v41, %v450_v50  ;;  %v452_v62 = vpop.f32.mrb[15].mxu1 }
 0x15d   :  { %v584_v63 = vmul.f32 %v568_v53, %v568_v53  ;;  %v262_v0 = vpop.f32.mrb[16].mxu0 }
 0x15e   :  { %v455_v2 = vpop.f32.mrb[16].mxu1  ;;  %v264_v28 = vpop.f32.mrb[17].mxu0 }
 0x15f   :  { %v599_v29 = vadd.f32 %v598_v52, %v584_v63  ;;  %v569_v38 = vsub.f32 %v262_v0, %v455_v2  ;;  %v457_v39 = vpop.f32.mrb[17].mxu1 }
 0x161   :  { %v585_v1 = vmul.f32 %v569_v38, %v569_v38  ;;  %v267_v4 = vpop.f32.mrb[18].mxu0 }
 0x162   :  { %v460_v5 = vpop.f32.mrb[18].mxu1  ;;  %v269_v6 = vpop.f32.mrb[19].mxu0 }
 0x163   :  { %v600_v9 = vadd.f32 %v599_v29, %v585_v1  ;;  %v570_v10 = vsub.f32 %v267_v4, %v460_v5  ;;  %v462_v11 = vpop.f32.mrb[19].mxu1 }
 0x165   :  { %v586_v13 = vmul.f32 %v570_v10, %v570_v10  ;;  %v272_v14 = vpop.f32.mrb[20].mxu0 }
 0x166   :  { %v465_v15 = vpop.f32.mrb[20].mxu1  ;;  %v274_v18 = vpop.f32.mrb[21].mxu0 }
 0x167   :  { %v601_v19 = vadd.f32 %v600_v9, %v586_v13  ;;  %v571_v20 = vsub.f32 %v272_v14, %v465_v15  ;;  %v467_v21 = vpop.f32.mrb[21].mxu1 }
 0x169   :  { %v587_v22 = vmul.f32 %v571_v20, %v571_v20  ;;  %v277_v23 = vpop.f32.mrb[22].mxu0 }
 0x16a   :  { %v470_v24 = vpop.f32.mrb[22].mxu1  ;;  %v279_v25 = vpop.f32.mrb[23].mxu0 }
 0x16b   :  { %v602_v30 = vadd.f32 %v601_v19, %v587_v22  ;;  %v572_v31 = vsub.f32 %v277_v23, %v470_v24  ;;  %v472_v32 = vpop.f32.mrb[23].mxu1 }
 0x16d   :  { %v588_v33 = vmul.f32 %v572_v31, %v572_v31  ;;  %v282_v34 = vpop.f32.mrb[24].mxu0 }
 0x16e   :  { %v475_v35 = vpop.f32.mrb[24].mxu1  ;;  %v284_v36 = vpop.f32.mrb[25].mxu0 }
 0x16f   :  { %v603_v37 = vadd.f32 %v602_v30, %v588_v33  ;;  %v573_v42 = vsub.f32 %v282_v34, %v475_v35  ;;  %v477_v43 = vpop.f32.mrb[25].mxu1 }
 0x171   :  { %v589_v44 = vmul.f32 %v573_v42, %v573_v42  ;;  %v287_v45 = vpop.f32.mrb[26].mxu0 }
 0x172   :  { %v480_v46 = vpop.f32.mrb[26].mxu1  ;;  %v289_v47 = vpop.f32.mrb[27].mxu0 }
 0x173   :  { %v604_v48 = vadd.f32 %v603_v37, %v589_v44  ;;  %v574_v49 = vsub.f32 %v287_v45, %v480_v46  ;;  %v482_v54 = vpop.f32.mrb[27].mxu1 }
 0x175   :  { %v590_v55 = vmul.f32 %v574_v49, %v574_v49  ;;  %v292_v56 = vpop.f32.mrb[28].mxu0 }
 0x176   :  { %v485_v57 = vpop.f32.mrb[28].mxu1  ;;  %v294_v58 = vpop.f32.mrb[29].mxu0 }
 0x177   :  { %v605_v59 = vadd.f32 %v604_v48, %v590_v55  ;;  %v575_v60 = vsub.f32 %v292_v56, %v485_v57  ;;  %v487_v61 = vpop.f32.mrb[29].mxu1 }
 0x179   :  { %v591_v3 = vmul.f32 %v575_v60, %v575_v60  ;;  %v297_v7 = vpop.f32.mrb[30].mxu0 }
 0x17a   :  { %v490_v8 = vpop.f32.mrb[30].mxu1  ;;  %v299_v12 = vpop.f32.mrb[31].mxu0 }
 0x17b   :  { %v576_v16 = vsub.f32 %v297_v7, %v490_v8  ;;  %v492_v17 = vpop.f32.mrb[31].mxu1  ;;  %v606_v26 = vadd.f32 %v605_v59, %v591_v3 }
 0x17d   :  { %v592_v27 = vmul.f32 %v576_v16, %v576_v16 }
 0x17f   :  { %v607_v40 = vadd.f32 %v606_v26, %v592_v27 }
 0x181   :  { %608 = vadd.xlane.f32.xlu0 %v607_v40 }
 0x20e   :  { %v609_v41 = vpop.xlane.xlu0 %608 }
 0x20f   :  { %v610_v50 = vrot.slane %v609_v41, 4 }
 0x211   :  { %v611_v51 = vadd.f32 %v610_v50, %v609_v41 }
 0x213   :  { %v612_v52 = vrot.slane %v611_v51, 2 }
 0x215   :  { %v613_v53 = vadd.f32 %v612_v52, %v611_v51 }
 0x217   :  { %v614_v62 = vrot.slane %v613_v53, 1 }
 0x219   :  { %v615_v63 = vadd.f32 %v614_v62, %v613_v53 }
 0x21b   :  { %699 = vpush %v615_v63 }
 0x24c   :  { %s700_s1 = spop %699 }
 0x24d   :  { %s617_s6 = smul.f32 1.4901161e-08, %s700_s1 }
 0x24f   :  { %619 = sst [smem:[#allocation9]] %s617_s6 }
 0x250   :  { %759 = shalt.err (!%p756_p4)
}
 0x251   :  { %s770_s14 = smov [#allocation9]  }
 0x252   :  { %627 = dma.smem_to_hbm %s770_s14, 16, %s1068_s2, [#allocation6]  }
 0x253   :  { %764 = dma.done.wait [#allocation6], 16  }
 0x254   :  { %765 = vsyncadd [#allocation6], 4294967280 }
 0x255   :  { %631 = sfence }
 0x256   :  { %632 = vsyncpa [#allocation5], 1 }
 0x257   :  { %633 = vsyncpa [#allocation8], 1 }
 0x258   :  { %634 = vsyncpa [#allocation6], 1 }

</bundles_post_ra>
